<compile_context>
chip_gen: v5e
topology: v5e:2x2
jax: 0.10.0
libtpu: 0.0.40
codegen_flags: <defaults>
</compile_context>

<pallas_src>
import functools

import numpy as np
import jax
import jax.numpy as jnp
from jax import lax
from jax.experimental import pallas as pl
from jax.experimental.pallas import tpu as pltpu


# ---------------------------------------------------------------------------
# Kernel 1: fused Q/K/V projections   {q,k,v}[b] @ W_{q,k,v} + b_{q,k,v}
# ---------------------------------------------------------------------------
def _qkv_proj_kernel(q_ref, k_ref, v_ref,
                     wq_ref, wk_ref, wv_ref,
                     bq_ref, bk_ref, bv_ref,
                     qp_ref, kp_ref, vp_ref):
    # Each activation tile is DMA'd exactly once; weights are fetched on the
    # first grid step only (constant block index across the grid).
    qp_ref[0] = (jnp.dot(q_ref[0], wq_ref[...],
                         preferred_element_type=jnp.float32)
                 + bq_ref[...]).astype(qp_ref.dtype)
    kp_ref[0] = (jnp.dot(k_ref[0], wk_ref[...],
                         preferred_element_type=jnp.float32)
                 + bk_ref[...]).astype(kp_ref.dtype)
    vp_ref[0] = (jnp.dot(v_ref[0], wv_ref[...],
                         preferred_element_type=jnp.float32)
                 + bv_ref[...]).astype(vp_ref.dtype)


def qkv_projection(q, k, v, params):
    """q:(B,Sq,H), k/v:(B,Sk,H) -> q_p:(B,Sq,P), k_p/v_p:(B,Sk,P)."""
    B, Sq, H = q.shape
    Sk = k.shape[1]
    P = params["wq_w"].shape[1]
    bq = params["wq_b"].reshape(1, P)
    bk = params["wk_b"].reshape(1, P)
    bv = params["wv_b"].reshape(1, P)
    # TODO(synk): for production hidden sizes, tile S (M), P (N) and H (K,
    #             'arbitrary' + f32 VMEM accumulator) and cast matmul
    #             operands to bf16; full weights per step only fit toy shapes.
    return pl.pallas_call(
        _qkv_proj_kernel,
        out_shape=(
            jax.ShapeDtypeStruct((B, Sq, P), q.dtype),
            jax.ShapeDtypeStruct((B, Sk, P), k.dtype),
            jax.ShapeDtypeStruct((B, Sk, P), v.dtype),
        ),
        grid_spec=pltpu.PrefetchScalarGridSpec(
            num_scalar_prefetch=0,
            grid=(B,),
            in_specs=[
                pl.BlockSpec((1, Sq, H), lambda b: (b, 0, 0)),
                pl.BlockSpec((1, Sk, H), lambda b: (b, 0, 0)),
                pl.BlockSpec((1, Sk, H), lambda b: (b, 0, 0)),
                pl.BlockSpec((H, P), lambda b: (0, 0)),
                pl.BlockSpec((H, P), lambda b: (0, 0)),
                pl.BlockSpec((H, P), lambda b: (0, 0)),
                pl.BlockSpec((1, P), lambda b: (0, 0)),
                pl.BlockSpec((1, P), lambda b: (0, 0)),
                pl.BlockSpec((1, P), lambda b: (0, 0)),
            ],
            out_specs=[
                pl.BlockSpec((1, Sq, P), lambda b: (b, 0, 0)),
                pl.BlockSpec((1, Sk, P), lambda b: (b, 0, 0)),
                pl.BlockSpec((1, Sk, P), lambda b: (b, 0, 0)),
            ],
        ),
        compiler_params=pltpu.CompilerParams(
            dimension_semantics=("parallel",)),
    )(q, k, v, params["wq_w"], params["wk_w"], params["wv_w"], bq, bk, bv)


# ---------------------------------------------------------------------------
# Kernel 2: attention (all heads per step) + fused output projection
# ---------------------------------------------------------------------------
def _attn_out_kernel(qp_ref, kp_ref, vp_ref, wo_ref, bo_ref,
                     out_ref, attn_ref, *, n_heads, head_size):
    # Heads are lane slices of the (S, nH*D) projections -- no head transpose
    # is ever materialized.  The merge-heads + output Linear is fused here as
    # a per-head accumulation ctx_h @ Wo[h*D:(h+1)*D, :].
    scale = 1.0 / np.sqrt(head_size)
    qp = qp_ref[0] * scale                 # fold 1/sqrt(d_k) into q (Sq, P)
    kp = kp_ref[0]                         # (Sk, P)
    vp = vp_ref[0]                         # (Sk, P)
    contract_last = (((1,), (1,)), ((), ()))   # contract last dims (no k.T)

    acc = jnp.zeros((qp.shape[0], wo_ref.shape[1]), jnp.float32)
    for h in range(n_heads):               # static unroll over heads
        sl = slice(h * head_size, (h + 1) * head_size)
        q_h = qp[:, sl]                    # (Sq, D)
        k_h = kp[:, sl]                    # (Sk, D)
        v_h = vp[:, sl]                    # (Sk, D)
        scores = lax.dot_general(q_h, k_h, contract_last,
                                 preferred_element_type=jnp.float32)  # (Sq,Sk)
        m = jnp.max(scores, axis=-1, keepdims=True)
        e = jnp.exp(scores - m)
        denom = jnp.sum(e, axis=-1, keepdims=True)
        w = e * pl.reciprocal(denom, approx=True)   # EUP vrcp (free slot)
        attn_ref[0, h] = w.astype(attn_ref.dtype)
        ctx_h = jnp.dot(w.astype(v_h.dtype), v_h,
                        preferred_element_type=jnp.float32)           # (Sq,D)
        acc = acc + jnp.dot(ctx_h.astype(wo_ref.dtype), wo_ref[sl, :],
                            preferred_element_type=jnp.float32)
    out_ref[0] = (acc + bo_ref[...]).astype(out_ref.dtype)


def attention_and_output(q_p, k_p, v_p, params, n_heads, head_size):
    """q_p:(B,Sq,P), k_p/v_p:(B,Sk,P) -> out:(B,Sq,H), attn:(B,nH,Sq,Sk)."""
    B, Sq, P = q_p.shape
    Sk = k_p.shape[1]
    H_out = params["wo_w"].shape[1]
    bo = params["wo_b"].reshape(1, H_out)

    # Extra parallel grid steps (megacore) when Sq is large; full Sq otherwise.
    tq = 128 if (Sq % 128 == 0) else Sq
    # TODO(synk): for long sequences, add an Sk 'arbitrary' grid axis with an
    #             online-softmax (flash-style) m/l/acc VMEM accumulator so the
    #             O(Sq*Sk) scores never live in VMEM at once (mandatory for
    #             v7x's 64 MiB VMEM at real sizes).

    kernel = functools.partial(_attn_out_kernel,
                               n_heads=n_heads, head_size=head_size)
    return pl.pallas_call(
        kernel,
        out_shape=(
            jax.ShapeDtypeStruct((B, Sq, H_out), q_p.dtype),
            jax.ShapeDtypeStruct((B, n_heads, Sq, Sk), q_p.dtype),
        ),
        grid_spec=pltpu.PrefetchScalarGridSpec(
            num_scalar_prefetch=0,
            grid=(B, Sq // tq),
            in_specs=[
                pl.BlockSpec((1, tq, P), lambda b, s: (b, s, 0)),
                pl.BlockSpec((1, Sk, P), lambda b, s: (b, 0, 0)),
                pl.BlockSpec((1, Sk, P), lambda b, s: (b, 0, 0)),
                pl.BlockSpec((P, H_out), lambda b, s: (0, 0)),
                pl.BlockSpec((1, H_out), lambda b, s: (0, 0)),
            ],
            out_specs=[
                pl.BlockSpec((1, tq, H_out), lambda b, s: (b, s, 0)),
                pl.BlockSpec((1, n_heads, tq, Sk), lambda b, s: (b, 0, s, 0)),
            ],
        ),
        compiler_params=pltpu.CompilerParams(
            dimension_semantics=("parallel", "parallel")),
    )(q_p, k_p, v_p, params["wo_w"], bo)


# ---------------------------------------------------------------------------
# MultiHeadAttention forward (2 fused Pallas calls, no wrapper transposes)
# ---------------------------------------------------------------------------
def multihead_attention(params, q, k, v, n_heads, head_size, attn_mask=None):
    if attn_mask is not None:
        # TODO(synk): attn_mask (masked_fill -1e9) path not wired into the
        #             Pallas kernel; refuse instead of silently ignoring it.
        raise NotImplementedError("attn_mask is not supported in this kernel")
    q_p, k_p, v_p = qkv_projection(q, k, v, params)
    output, attn_weights = attention_and_output(
        q_p, k_p, v_p, params, n_heads, head_size)
    return output, attn_weights


# ---------------------------------------------------------------------------
# Deterministic parameter init (matches nn.Linear shapes, stored transposed)
# ---------------------------------------------------------------------------
def init_params(key, hidden_size, head_size, n_heads):
    proj = head_size * n_heads
    ks = jax.random.split(key, 8)

    def lin(kw, kb, fan_in, fan_out):
        bound = 1.0 / np.sqrt(fan_in)
        w = jax.random.uniform(kw, (fan_in, fan_out), jnp.float32, -bound, bound)
        b = jax.random.uniform(kb, (fan_out,), jnp.float32, -bound, bound)
        return w, b

    wq_w, wq_b = lin(ks[0], ks[1], hidden_size, proj)
    wk_w, wk_b = lin(ks[2], ks[3], hidden_size, proj)
    wv_w, wv_b = lin(ks[4], ks[5], hidden_size, proj)
    wo_w, wo_b = lin(ks[6], ks[7], proj, hidden_size)
    return dict(wq_w=wq_w, wq_b=wq_b, wk_w=wk_w, wk_b=wk_b,
                wv_w=wv_w, wv_b=wv_b, wo_w=wo_w, wo_b=wo_b)


# ---------------------------------------------------------------------------
# Pure-JAX reference (for correctness check)
# ---------------------------------------------------------------------------
def reference(params, q, k, v, n_heads, head_size):
    def lin(x, w, b):
        return x @ w + b

    B = q.shape[0]

    def split(x):
        Bx, Sx, _ = x.shape
        return x.reshape(Bx, Sx, n_heads, head_size).transpose(0, 2, 1, 3)

    q_s = split(lin(q, params["wq_w"], params["wq_b"]))
    k_s = split(lin(k, params["wk_w"], params["wk_b"]))
    v_s = split(lin(v, params["wv_w"], params["wv_b"]))
    scores = jnp.einsum("bhqd,bhkd->bhqk", q_s, k_s) / np.sqrt(head_size)
    w = jax.nn.softmax(scores, axis=-1)
    ctx = jnp.einsum("bhqk,bhkd->bhqd", w, v_s)
    ctx = ctx.transpose(0, 2, 1, 3).reshape(B, q.shape[1], n_heads * head_size)
    return lin(ctx, params["wo_w"], params["wo_b"]), w


if __name__ == "__main__":
    hidden_size, head_size, n_heads = 32, 8, 4
    B, S = 2, 8

    key = jax.random.PRNGKey(0)
    kparams, kq, kk, kv = jax.random.split(key, 4)
    params = init_params(kparams, hidden_size, head_size, n_heads)

    q = jax.random.normal(kq, (B, S, hidden_size), jnp.float32)
    k = jax.random.normal(kk, (B, S, hidden_size), jnp.float32)
    v = jax.random.normal(kv, (B, S, hidden_size), jnp.float32)

    out, attn = multihead_attention(params, q, k, v, n_heads, head_size)
    out = jax.block_until_ready(out)
    attn = jax.block_until_ready(attn)

    out_ref, attn_w_ref = reference(params, q, k, v, n_heads, head_size)
    assert out.shape == (B, S, hidden_size)
    assert attn.shape == (B, n_heads, S, S)
    # Tolerance loosened vs. exact softmax because the kernel uses the EUP
    # approximate reciprocal (pl.reciprocal(..., approx=True)).
    assert jnp.allclose(out, out_ref, atol=1e-2, rtol=1e-2)
    assert jnp.allclose(attn, attn_w_ref, atol=1e-2, rtol=1e-2)

    print("KERNEL_OK")
</pallas_src>

<mosaic_0001>
module attributes {stable_mosaic.version = 11 : i64} {
  func.func @_qkv_proj_kernel(%arg0: i32, %arg1: memref<1x8x32xf32, #tpu.memory_space<vmem>>, %arg2: memref<1x8x32xf32, #tpu.memory_space<vmem>>, %arg3: memref<1x8x32xf32, #tpu.memory_space<vmem>>, %arg4: memref<32x32xf32, #tpu.memory_space<vmem>>, %arg5: memref<32x32xf32, #tpu.memory_space<vmem>>, %arg6: memref<32x32xf32, #tpu.memory_space<vmem>>, %arg7: memref<1x32xf32, #tpu.memory_space<vmem>>, %arg8: memref<1x32xf32, #tpu.memory_space<vmem>>, %arg9: memref<1x32xf32, #tpu.memory_space<vmem>>, %arg10: memref<1x8x32xf32, #tpu.memory_space<vmem>>, %arg11: memref<1x8x32xf32, #tpu.memory_space<vmem>>, %arg12: memref<1x8x32xf32, #tpu.memory_space<vmem>>) attributes {dimension_semantics = [#tpu.dimension_semantics<parallel>], iteration_bounds = array<i64: 2>, scalar_prefetch = 0 : i64, scratch_operands = 0 : i64, tpu.core_type = #tpu.core_type<tc>, window_params = [{transform_indices = @transform_0, window_bounds = array<i64: 1, 8, 32>}, {transform_indices = @transform_1, window_bounds = array<i64: 1, 8, 32>}, {transform_indices = @transform_2, window_bounds = array<i64: 1, 8, 32>}, {pipeline_mode = #tpu.pipeline_mode<synchronous>, transform_indices = @transform_3, window_bounds = array<i64: 32, 32>}, {pipeline_mode = #tpu.pipeline_mode<synchronous>, transform_indices = @transform_4, window_bounds = array<i64: 32, 32>}, {pipeline_mode = #tpu.pipeline_mode<synchronous>, transform_indices = @transform_5, window_bounds = array<i64: 32, 32>}, {pipeline_mode = #tpu.pipeline_mode<synchronous>, transform_indices = @transform_6, window_bounds = array<i64: 1, 32>}, {pipeline_mode = #tpu.pipeline_mode<synchronous>, transform_indices = @transform_7, window_bounds = array<i64: 1, 32>}, {pipeline_mode = #tpu.pipeline_mode<synchronous>, transform_indices = @transform_8, window_bounds = array<i64: 1, 32>}, {transform_indices = @transform_9, window_bounds = array<i64: 1, 8, 32>}, {transform_indices = @transform_10, window_bounds = array<i64: 1, 8, 32>}, {transform_indices = @transform_11, window_bounds = array<i64: 1, 8, 32>}]} {
    %c0 = arith.constant 0 : index
    %c0_0 = arith.constant 0 : index
    %c0_1 = arith.constant 0 : index
    %0 = vector.load %arg1[%c0, %c0_0, %c0_1] : memref<1x8x32xf32, #tpu.memory_space<vmem>>, vector<1x8x32xf32>
    %1 = vector.shape_cast %0 : vector<1x8x32xf32> to vector<8x32xf32>
    %c0_2 = arith.constant 0 : index
    %c0_3 = arith.constant 0 : index
    %2 = vector.load %arg4[%c0_2, %c0_3] : memref<32x32xf32, #tpu.memory_space<vmem>>, vector<32x32xf32>
    %cst = arith.constant dense<0.000000e+00> : vector<8x32xf32>
    %3 = tpu.matmul %1, %2, %cst {dimension_numbers = #tpu.dot_dimension_numbers<[1], [0], [0], [1], [0, 0, 1, 1], [], []>} : vector<8x32xf32>, vector<32x32xf32>, vector<8x32xf32> -> vector<8x32xf32>
    %c0_4 = arith.constant 0 : index
    %c0_5 = arith.constant 0 : index
    %4 = vector.load %arg7[%c0_4, %c0_5] : memref<1x32xf32, #tpu.memory_space<vmem>>, vector<1x32xf32>
    %5 = vector.broadcast %4 : vector<1x32xf32> to vector<8x32xf32>
    %6 = arith.addf %3, %5 : vector<8x32xf32>
    %c0_6 = arith.constant 0 : index
    %c0_7 = arith.constant 0 : index
    %c0_8 = arith.constant 0 : index
    %7 = vector.load %arg10[%c0_6, %c0_7, %c0_8] : memref<1x8x32xf32, #tpu.memory_space<vmem>>, vector<1x8x32xf32>
    %8 = vector.shape_cast %7 : vector<1x8x32xf32> to vector<8x32xf32>
    %9 = vector.shape_cast %6 : vector<8x32xf32> to vector<1x8x32xf32>
    tpu.vector_store %arg10[%c0_6, %c0_7, %c0_8], %9 {strides = array<i32>} : memref<1x8x32xf32, #tpu.memory_space<vmem>>, vector<1x8x32xf32>,
    %c0_9 = arith.constant 0 : index
    %c0_10 = arith.constant 0 : index
    %c0_11 = arith.constant 0 : index
    %10 = vector.load %arg2[%c0_9, %c0_10, %c0_11] : memref<1x8x32xf32, #tpu.memory_space<vmem>>, vector<1x8x32xf32>
    %11 = vector.shape_cast %10 : vector<1x8x32xf32> to vector<8x32xf32>
    %c0_12 = arith.constant 0 : index
    %c0_13 = arith.constant 0 : index
    %12 = vector.load %arg5[%c0_12, %c0_13] : memref<32x32xf32, #tpu.memory_space<vmem>>, vector<32x32xf32>
    %cst_14 = arith.constant dense<0.000000e+00> : vector<8x32xf32>
    %13 = tpu.matmul %11, %12, %cst_14 {dimension_numbers = #tpu.dot_dimension_numbers<[1], [0], [0], [1], [0, 0, 1, 1], [], []>} : vector<8x32xf32>, vector<32x32xf32>, vector<8x32xf32> -> vector<8x32xf32>
    %c0_15 = arith.constant 0 : index
    %c0_16 = arith.constant 0 : index
    %14 = vector.load %arg8[%c0_15, %c0_16] : memref<1x32xf32, #tpu.memory_space<vmem>>, vector<1x32xf32>
    %15 = vector.broadcast %14 : vector<1x32xf32> to vector<8x32xf32>
    %16 = arith.addf %13, %15 : vector<8x32xf32>
    %c0_17 = arith.constant 0 : index
    %c0_18 = arith.constant 0 : index
    %c0_19 = arith.constant 0 : index
    %17 = vector.load %arg11[%c0_17, %c0_18, %c0_19] : memref<1x8x32xf32, #tpu.memory_space<vmem>>, vector<1x8x32xf32>
    %18 = vector.shape_cast %17 : vector<1x8x32xf32> to vector<8x32xf32>
    %19 = vector.shape_cast %16 : vector<8x32xf32> to vector<1x8x32xf32>
    tpu.vector_store %arg11[%c0_17, %c0_18, %c0_19], %19 {strides = array<i32>} : memref<1x8x32xf32, #tpu.memory_space<vmem>>, vector<1x8x32xf32>,
    %c0_20 = arith.constant 0 : index
    %c0_21 = arith.constant 0 : index
    %c0_22 = arith.constant 0 : index
    %20 = vector.load %arg3[%c0_20, %c0_21, %c0_22] : memref<1x8x32xf32, #tpu.memory_space<vmem>>, vector<1x8x32xf32>
    %21 = vector.shape_cast %20 : vector<1x8x32xf32> to vector<8x32xf32>
    %c0_23 = arith.constant 0 : index
    %c0_24 = arith.constant 0 : index
    %22 = vector.load %arg6[%c0_23, %c0_24] : memref<32x32xf32, #tpu.memory_space<vmem>>, vector<32x32xf32>
    %cst_25 = arith.constant dense<0.000000e+00> : vector<8x32xf32>
    %23 = tpu.matmul %21, %22, %cst_25 {dimension_numbers = #tpu.dot_dimension_numbers<[1], [0], [0], [1], [0, 0, 1, 1], [], []>} : vector<8x32xf32>, vector<32x32xf32>, vector<8x32xf32> -> vector<8x32xf32>
    %c0_26 = arith.constant 0 : index
    %c0_27 = arith.constant 0 : index
    %24 = vector.load %arg9[%c0_26, %c0_27] : memref<1x32xf32, #tpu.memory_space<vmem>>, vector<1x32xf32>
    %25 = vector.broadcast %24 : vector<1x32xf32> to vector<8x32xf32>
    %26 = arith.addf %23, %25 : vector<8x32xf32>
    %c0_28 = arith.constant 0 : index
    %c0_29 = arith.constant 0 : index
    %c0_30 = arith.constant 0 : index
    %27 = vector.load %arg12[%c0_28, %c0_29, %c0_30] : memref<1x8x32xf32, #tpu.memory_space<vmem>>, vector<1x8x32xf32>
    %28 = vector.shape_cast %27 : vector<1x8x32xf32> to vector<8x32xf32>
    %29 = vector.shape_cast %26 : vector<8x32xf32> to vector<1x8x32xf32>
    tpu.vector_store %arg12[%c0_28, %c0_29, %c0_30], %29 {strides = array<i32>} : memref<1x8x32xf32, #tpu.memory_space<vmem>>, vector<1x8x32xf32>,
    return
  }
  func.func @transform_0(%arg0: i32) -> (i32, i32, i32) {
    %c0_i32 = arith.constant 0 : i32
    %c0_i32_0 = arith.constant 0 : i32
    %c0_i32_1 = arith.constant 0 : i32
    return %arg0, %c0_i32, %c0_i32_0 : i32, i32, i32
  }
  func.func @transform_1(%arg0: i32) -> (i32, i32, i32) {
    %c0_i32 = arith.constant 0 : i32
    %c0_i32_0 = arith.constant 0 : i32
    %c0_i32_1 = arith.constant 0 : i32
    return %arg0, %c0_i32, %c0_i32_0 : i32, i32, i32
  }
  func.func @transform_2(%arg0: i32) -> (i32, i32, i32) {
    %c0_i32 = arith.constant 0 : i32
    %c0_i32_0 = arith.constant 0 : i32
    %c0_i32_1 = arith.constant 0 : i32
    return %arg0, %c0_i32, %c0_i32_0 : i32, i32, i32
  }
  func.func @transform_3(%arg0: i32) -> (i32, i32) {
    %c0_i32 = arith.constant 0 : i32
    %c0_i32_0 = arith.constant 0 : i32
    %c0_i32_1 = arith.constant 0 : i32
    return %c0_i32, %c0_i32_0 : i32, i32
  }
  func.func @transform_4(%arg0: i32) -> (i32, i32) {
    %c0_i32 = arith.constant 0 : i32
    %c0_i32_0 = arith.constant 0 : i32
    %c0_i32_1 = arith.constant 0 : i32
    return %c0_i32, %c0_i32_0 : i32, i32
  }
  func.func @transform_5(%arg0: i32) -> (i32, i32) {
    %c0_i32 = arith.constant 0 : i32
    %c0_i32_0 = arith.constant 0 : i32
    %c0_i32_1 = arith.constant 0 : i32
    return %c0_i32, %c0_i32_0 : i32, i32
  }
  func.func @transform_6(%arg0: i32) -> (i32, i32) {
    %c0_i32 = arith.constant 0 : i32
    %c0_i32_0 = arith.constant 0 : i32
    %c0_i32_1 = arith.constant 0 : i32
    return %c0_i32, %c0_i32_0 : i32, i32
  }
  func.func @transform_7(%arg0: i32) -> (i32, i32) {
    %c0_i32 = arith.constant 0 : i32
    %c0_i32_0 = arith.constant 0 : i32
    %c0_i32_1 = arith.constant 0 : i32
    return %c0_i32, %c0_i32_0 : i32, i32
  }
  func.func @transform_8(%arg0: i32) -> (i32, i32) {
    %c0_i32 = arith.constant 0 : i32
    %c0_i32_0 = arith.constant 0 : i32
    %c0_i32_1 = arith.constant 0 : i32
    return %c0_i32, %c0_i32_0 : i32, i32
  }
  func.func @transform_9(%arg0: i32) -> (i32, i32, i32) {
    %c0_i32 = arith.constant 0 : i32
    %c0_i32_0 = arith.constant 0 : i32
    %c0_i32_1 = arith.constant 0 : i32
    return %arg0, %c0_i32, %c0_i32_0 : i32, i32, i32
  }
  func.func @transform_10(%arg0: i32) -> (i32, i32, i32) {
    %c0_i32 = arith.constant 0 : i32
    %c0_i32_0 = arith.constant 0 : i32
    %c0_i32_1 = arith.constant 0 : i32
    return %arg0, %c0_i32, %c0_i32_0 : i32, i32, i32
  }
  func.func @transform_11(%arg0: i32) -> (i32, i32, i32) {
    %c0_i32 = arith.constant 0 : i32
    %c0_i32_0 = arith.constant 0 : i32
    %c0_i32_1 = arith.constant 0 : i32
    return %arg0, %c0_i32, %c0_i32_0 : i32, i32, i32
  }
}

</mosaic_0001>

<bundles_post_ra>
// kernel: tpu_custom_call.1
= control target key start
LH: loop header
LB: loop body
LE: loop exit
PB: predicated region body
PF: predicated region fallthrough
CT: control target
= control target key end

     0   :  { %s1745_s0 = inlined_call_operand.hbm [shape: f32[2,8,32], index: 0, kind: input, shape index: {}]   ;;  %s1746_s1 = inlined_call_operand.hbm [shape: f32[2,8,32], index: 1, kind: input, shape index: {}]   ;;  %s1747_s2 = inlined_call_operand.hbm [shape: f32[2,8,32], index: 2, kind: input, shape index: {}]   ;;  %s1748_s3 = inlined_call_operand.hbm [shape: f32[32,32], index: 3, kind: input, shape index: {}]   ;;  %s1749_s4 = inlined_call_operand.hbm [shape: f32[32,32], index: 4, kind: input, shape index: {}]   ;;  %s1750_s5 = inlined_call_operand.hbm [shape: f32[32,32], index: 5, kind: input, shape index: {}]   ;;  %s1751_s6 = inlined_call_operand.vmem [shape: f32[1,32], index: 6, kind: input, shape index: {}]   ;;  %s1752_s7 = inlined_call_operand.vmem [shape: f32[1,32], index: 7, kind: input, shape index: {}]   ;;  %s1753_s8 = inlined_call_operand.vmem [shape: f32[1,32], index: 8, kind: input, shape index: {}]   ;;  %s1754_s9 = inlined_call_operand.hbm [shape: f32[2,8,32], index: 9, kind: output, shape index: {0}]   ;;  %s1755_s10 = inlined_call_operand.hbm [shape: f32[2,8,32], index: 10, kind: output, shape index: {1}]   ;;  %s1756_s11 = inlined_call_operand.hbm [shape: f32[2,8,32], index: 11, kind: output, shape index: {2}]  }
   0x1   :  { %1774 = sst [smem:[#allocation30_spill]] %s1746_s1 }
   0x2   :  { %1775 = sst [smem:[#allocation31_spill]] %s1748_s3 }
   0x3   :  { %1776 = sst [smem:[#allocation32_spill]] %s1751_s6 }
   0x4   :  { %1777 = sst [smem:[#allocation33_spill]] %s1753_s8 }
   0x5   :  { %1778 = sst [smem:[#allocation34_spill]] %s1756_s11 }
   0x6   :  { %17 = vsyncpa [#allocation3], 0 }
   0x7   :  { %19 = vsyncpa [#allocation3 + $0x1], 0 }
   0x8   :  { %20 = vsyncpa [#allocation6], 0 }
   0x9   :  { %22 = vsyncpa [#allocation6 + $0x1], 0 }
   0xa   :  { %23 = vsyncpa [#allocation9], 0 }
   0xb   :  { %24 = vsyncpa [#allocation12], 0 }
   0xc   :  { %25 = vsyncpa [#allocation4], 0 }
   0xd   :  { %27 = vsyncpa [#allocation4 + $0x1], 0 }
   0xe   :  { %28 = vsyncpa [#allocation15], 0 }
   0xf   :  { %30 = vsyncpa [#allocation15 + $0x1], 0  ;;  %s1426_s17 = smov 0   ;;  %s1428_s18 = smov 0  }
  0x10   :  { %s1430_s19 = smov 0   ;;  %s1432_s20 = smov 0  }
  0x11 LB: > { %1779 = sst [smem:[#allocation23_spill]] %s1347_s17  ;;  %s1450_s24 = sadd.s32 4294967295, %s1359_s20   ;;  %s1359_s20 = sphi %s1432_s20, %s1812_s20   ;;  %s1355_s19 = sphi %s1430_s19, %s1816_s19   ;;  %s1351_s18 = sphi %s1428_s18, %s1815_s18   ;;  %s1347_s17 = sphi %s1426_s17, %s1814_s17  }
  0x12   : > { %1780 = sst [smem:[#allocation24_spill]] %s1359_s20  ;;  %p907_p0 = scmp.ge.s32.totalorder %s1359_s20, 1 }
  0x13   : > { %s1781_s3 = sld [smem:[#allocation31_spill]]  ;;  %p1772_p1 = scmp.eq.s32.totalorder %s1450_s24, 0 }
  0x14   : > { %p323_p2 = scmp.lt.s32.totalorder %s1359_s20, 3  ;;  %s1361_s26 = smov [#allocation8]  }
  0x15   : > { %s336_s27 = sshll.u32 %s1361_s26, 4  ;;  %s1758_s29 = smov 128   ;;  %s337_s27 = int_to_ptr.vmem [resolvable:$true] %s336_s27 }
  0x16   : > { %p1455_p3 = pnand %p907_p0, %p323_p2  ;;  %s1760_s30 = smov 8  }
  0x17   : > { %s1757_s12 = sadd.s32 4294967294, %s1359_s20   ;;  %s1475_s13 = sadd.s32 1, %s1359_s20  }
  0x18   : > { %p963_p4 = pneg %p1455_p3  ;;  %1784 = sst [smem:[#allocation25_spill]] %s1475_s13 }
  0x19   : > { %s334_s23 = sshll.u32 %s1781_s3, 4  ;;  %s43_s14 = sadd.s32 1, %s1355_s19  ;;  %s335_s23 = int_to_ptr.hbm [resolvable:$true] %s334_s23 }
  0x1a   : > { %p1464_p6 = pnand %p963_p4, %p1772_p1  ;;  %s40_s15 = ssub.s32 %s1359_s20, %s1475_s13 }
  0x1b   : > { %p50_p7 = scmp.ne.s32.totalorder %s1355_s19, %s1351_s18  ;;  %p41_p8 = scmp.eq.s32.totalorder %s40_s15, 0 }
  0x1c   : > { %966 = dma.hbm_to_vmem [thread:$0]  (!%p1464_p6), %s335_s23, 512, %s337_s27, [#allocation9], %s1758_s29, %s1758_s29, %s1760_s30  }
  0x1d   : > { %p51_p9 = scmp.eq.s32.totalorder %s1359_s20, 0  ;;  %p56_p10 = scmp.ne.s32.totalorder %s1351_s18, %s1347_s17 }
  0x1e   : > { %p258_p11 = scmp.eq.s32.totalorder %s1450_s24, 1  ;;  %p264_p2 = scmp.eq.s32.totalorder %s1757_s12, 1 }
  0x1f   : > { %s1487_s16 = scalar_select %p41_p8, %s1355_s19, %s43_s14  }
  0x20   : > { %p52_p12 = por %p51_p9, %p50_p7  ;;  %p1491_p13 = por %p1772_p1, %p56_p10 }
  0x21   : > { %1785 = sst [smem:[#allocation26_spill]] %s1487_s16  ;;  %p1495_p0 = por %p258_p11, %p50_p7 }
  0x22   : > { %p996_p4 = scmp.lt.s32.totalorder %s1359_s20, 2  ;;  %s1765_s23 = sand.u32 1, %s1355_s19  }
  0x23   : > { %s1787_s22 = scalar_select %p1495_p0, 1, 0 }
  0x24   : > { %p1503_p5 = por %p264_p2, %p56_p10  ;;  %s1509_s27 = sshll.u32 %s1765_s23, 3 }
  0x25   : > { %1788 = sst [smem:[#allocation27_spill]] %s1787_s22  ;;  %s1512_s14 = sshll.u32 %s1359_s20, 3 }
  0x26   : > { %s1789_s26 = scalar_select %p1503_p5, 1, 0 }
  0x27   : > { %p1514_p8 = pnand %p996_p4, %p52_p12  ;;  %s406_s12 = sand.u32 1, %s1359_s20  }
  0x28   : > { %1790 = sst [smem:[#allocation28_spill]] %s1789_s26  ;;  %s410_s16 = scalar_lea.vmem [#allocation5], %s1509_s27 }
  0x29   : > { %s1792_s1 = sld [smem:[#allocation30_spill]]  ;;  %s418_s13 = sshll.u32 %s410_s16, 4  ;;  %s419_s13 = int_to_ptr.vmem [resolvable:$true] %s418_s13 }
  0x2a   : > { %s348_s8 = sshll.u32 %s1749_s4, 4  ;;  %s1527_s22 = scalar_lea.sflag [#allocation6], %s406_s12  ;;  %s349_s8 = int_to_ptr.hbm [resolvable:$true] %s348_s8 }
  0x2b   : > { %p1075_p9 = pneg %p1514_p8 }
  0x2f   : > { %s414_s3 = scalar_lea.hbm %s1792_s1, %s1512_s14  ;;  %s1078_s30 = scalar_lea.hbm %s1792_s1, 16 }
  0x30   : > { %s416_s26 = sshll.u32 %s414_s3, 4  ;;  %s417_s26 = int_to_ptr.hbm [resolvable:$true] %s416_s26 }
  0x31   : > { %s1071_s11 = sshra.s32 %s417_s26, 4  ;;  %s1072_s11 = int_to_ptr.hbm [resolvable:$true] %s1071_s11 }
  0x32   : > { %s1073_s6 = scalar_lea.hbm %s1072_s11, 8  ;;  %p1079_p12 = scmp.lt.s32.totalorder %s1072_s11, %s1792_s1 }
  0x33   : > { %p1074_p7 = scmp.ne.s32.totalorder %s1072_s11, %s1073_s6  ;;  %p1080_p2 = scmp.lt.s32.totalorder %s1078_s30, %s1073_s6 }
  0x35   : > { %p1076_p10 = pnand %p1075_p9, %p1074_p7  ;;  %p1081_p4 = por %p1080_p2, %p1079_p12 }
  0x37   : > { %p1077_p11 = pneg %p1076_p10 }
  0x39   : > { %p1082_p1 = pnand %p1081_p4, %p1077_p11 }
  0x3b   : > { %1085 = shalt.err (!%p1082_p1)
}
  0x3c   : > { %979 = dma.hbm_to_vmem [thread:$0]  (!%p1514_p8), %s417_s26, 128, %s419_s13, %s1527_s22  }
  0x3d   : > { %s1364_s17 = smov [#allocation10]   ;;  %s362_s11 = sshll.u32 %s1750_s5, 4  ;;  %s363_s11 = int_to_ptr.hbm [resolvable:$true] %s362_s11 }
  0x3e   : > { %s350_s12 = sshll.u32 %s1364_s17, 4  ;;  %s1793_s6 = smov 8   ;;  %s351_s12 = int_to_ptr.vmem [resolvable:$true] %s350_s12 }
  0x3f   : > { %s1794_s20 = smov 128   ;;  %s1365_s3 = smov [#allocation11]  }
  0x40   : > { %969 = dma.hbm_to_vmem [thread:$0]  (!%p1464_p6), %s349_s8, 512, %s351_s12, [#allocation9], %s1794_s20, %s1794_s20, %s1793_s6  }
  0x41   : > { %s364_s30 = sshll.u32 %s1365_s3, 4  ;;  %s395_s16 = scalar_lea.hbm %s1745_s0, %s1512_s14  ;;  %s365_s30 = int_to_ptr.vmem [resolvable:$true] %s364_s30 }
  0x42   : > { %972 = dma.hbm_to_vmem [thread:$0]  (!%p1464_p6), %s363_s11, 512, %s365_s30, [#allocation12], %s1794_s20, %s1794_s20, %s1793_s6  }
  0x43   : > { %s397_s17 = sshll.u32 %s395_s16, 4  ;;  %s391_s23 = scalar_lea.vmem [#allocation2], %s1509_s27  ;;  %s398_s17 = int_to_ptr.hbm [resolvable:$true] %s397_s17 }
  0x44   : > { %s399_s29 = sshll.u32 %s391_s23, 4  ;;  %s1795_s1 = sand.u32 1, %s1355_s19   ;;  %s400_s29 = int_to_ptr.vmem [resolvable:$true] %s399_s29 }
  0x45   : > { %s388_s8 = scalar_lea.sflag [#allocation3], %s1795_s1  ;;  %s1161_s12 = sshra.s32 %s398_s17, 4  ;;  %s1162_s12 = int_to_ptr.hbm [resolvable:$true] %s1161_s12 }
  0x46   : > { %s1163_s3 = scalar_lea.hbm %s1162_s12, 8  ;;  %s1168_s26 = scalar_lea.hbm %s1745_s0, 16 }
  0x47   : > { %p1164_p1 = scmp.ne.s32.totalorder %s1162_s12, %s1163_s3  ;;  %p1169_p6 = scmp.lt.s32.totalorder %s1162_s12, %s1745_s0 }
  0x48   : > { %p1170_p11 = scmp.lt.s32.totalorder %s1168_s26, %s1163_s3 }
  0x49   : > { %p1166_p7 = pnand %p1164_p1, %p1075_p9 }
  0x4a   : > { %p1171_p12 = por %p1170_p11, %p1169_p6 }
  0x4b   : > { %p1167_p10 = pneg %p1166_p7 }
  0x4d   : > { %p1172_p2 = pnand %p1171_p12, %p1167_p10 }
  0x4f   : > { %1175 = shalt.err (!%p1172_p2)
}
  0x50   : > { %976 = dma.hbm_to_vmem [thread:$0]  (!%p1514_p8), %s398_s17, 128, %s400_s29, %s388_s8  }
  0x51   : > { %s433_s30 = scalar_lea.hbm %s1747_s2, %s1512_s14  ;;  %s429_s23 = scalar_lea.vmem [#allocation7], %s1509_s27 }
  0x52   : > { %s435_s16 = sshll.u32 %s433_s30, 4  ;;  %s437_s28 = sshll.u32 %s429_s23, 4  ;;  %s436_s16 = int_to_ptr.hbm [resolvable:$true] %s435_s16  ;;  %s438_s28 = int_to_ptr.vmem [resolvable:$true] %s437_s28 }
  0x53   : > { %s1191_s12 = sshra.s32 %s436_s16, 4  ;;  %s1198_s17 = scalar_lea.hbm %s1747_s2, 16  ;;  %s1192_s12 = int_to_ptr.hbm [resolvable:$true] %s1191_s12 }
  0x54   : > { %s1193_s3 = scalar_lea.hbm %s1192_s12, 8  ;;  %p1199_p10 = scmp.lt.s32.totalorder %s1192_s12, %s1747_s2 }
  0x55   : > { %p1194_p4 = scmp.ne.s32.totalorder %s1192_s12, %s1193_s3  ;;  %p1200_p6 = scmp.lt.s32.totalorder %s1198_s17, %s1193_s3 }
  0x57   : > { %p1196_p1 = pnand %p1194_p4, %p1075_p9  ;;  %p1201_p11 = por %p1200_p6, %p1199_p10 }
  0x59   : > { %p1197_p7 = pneg %p1196_p1 }
  0x5b   : > { %p1202_p12 = pnand %p1201_p11, %p1197_p7 }
  0x5d   : > { %1205 = shalt.err (!%p1202_p12)
}
  0x5e   : > { %982 = dma.hbm_to_vmem [thread:$0]  (!%p1514_p8), %s436_s16, 128, %s438_s28, %s1527_s22  }
  0x5f   : > { %446 = sbr.rel (%p1455_p3) target bundleno = 282 (0x11a), region = 56 }
  0x64   : > { %s1594_s27 = sand.u32 1, %s1351_s18  }
  0x65   : > { %s1597_s14 = sshll.u32 %s1594_s27, 3  ;;  %s449_s11 = scalar_lea.sflag [#allocation3], %s1594_s27 }
  0x66   : > { %s452_s6 = scalar_lea.vmem [#allocation2], %s1597_s14 }
  0x67   : > { %1322 = dma.done.wait (%p1491_p13), %s449_s11, 128  }
  0x68   : > { %1324 = vsyncadd (%p1491_p13), %s449_s11, 4294967168  ;;  %s458_s25 = sand.u32 1, %s1450_s24   ;;  %s462_s15 = scalar_lea.vmem [#allocation5], %s1597_s14 }
  0x69   : > { %s459_s22 = scalar_lea.sflag [#allocation6], %s458_s25 }
  0x6a   : > { %1326 = dma.done.wait (%p1491_p13), %s459_s22, 256  }
  0x6b   : > { %1328 = vsyncadd (%p1491_p13), %s459_s22, 4294967040  ;;  %s472_s1 = scalar_lea.vmem [#allocation7], %s1597_s14  ;;  %p1796_p3 = scmp.eq.s32.totalorder %s1450_s24, 0 }
  0x6d   : > { %1330 = dma.done.wait (%p1796_p3), [#allocation9], 1024   ;;  %p1797_p8 = pmov %p1796_p3 }
  0x6e   : > { %p1798_p9 = pmov %p1796_p3 }
  0x6f   : > { %1332 = vsyncadd (%p1797_p8), [#allocation9], 4294966272 }
  0x70   : > { %1334 = dma.done.wait (%p1798_p9), [#allocation12], 512   ;;  %p1799_p2 = pmov %p1796_p3 }
  0x71   : > { %v618_v0 = vld [vmem:[#allocation11 + $0x18] sm:$0xff]  ;;  %v617_v1 = vld [vmem:[#allocation11 + $0x10] sm:$0xff]  ;;  %v616_v4 = vld [vmem:[#allocation11 + $0x8] sm:$0xff]  ;;  %vm556_vm0 = vcmask 261120   ;;  %s934_s21 = sshll.u32 %s1450_s24, 3  ;;  %s539_s23 = scalar_lea.vmem [#allocation14], %s1597_s14 }
  0x72   : > { %1336 = vsyncadd (%p1799_p2), [#allocation12], 4294966784  ;;  %638 = vmatpush.msra.mxu2 %v618_v0  ;;  %v585_v2 = vld [vmem:[#allocation10 + $0x18] sm:$0xff]  ;;  %v584_v5 = vld [vmem:[#allocation10 + $0x10] sm:$0xff]  ;;  %s682_s16 = scalar_lea.hbm %s1755_s10, %s934_s21  ;;  %s1634_s28 = sshll.u32 %s539_s23, 4  ;;  %s685_s28 = int_to_ptr.vmem [resolvable:$true] %s1634_s28 }
  0x73   : > { %v551_v3 = vld [vmem:[#allocation8 + $0x18] sm:$0xff]  ;;  %605 = vmatpush.msra.mxu1 %v585_v2  ;;  %v550_v6 = vld [vmem:[#allocation8 + $0x10] sm:$0xff]  ;;  %v583_v7 = vld [vmem:[#allocation10 + $0x8] sm:$0xff]  ;;  %s668_s13 = scalar_lea.hbm %s1754_s9, %s934_s21  ;;  %s1800_s11 = sld [smem:[#allocation32_spill]] }
  0x74   : > { %572 = vmatpush.msra.mxu0 %v551_v3  ;;  %639 = vmatpush.msra.mxu2 %v617_v1  ;;  %v549_v8 = vld [vmem:[#allocation8 + $0x8] sm:$0xff]  ;;  %v615_v9 = vld [vmem:[#allocation11] sm:$0xff]  ;;  %v614_v10 = vld [vmem:[%s472_s1] sm:$0xff]  ;;  %s532_s22 = scalar_lea.vmem [#allocation13], %s1597_s14  ;;  %s1653_s1 = sshll.u32 %s668_s13, 4  ;;  %s673_s1 = int_to_ptr.hbm [resolvable:$true] %s1653_s1 }
  0x75   : > { %606 = vmatpush.msra.mxu1 %v584_v5  ;;  %v582_v11 = vld [vmem:[#allocation10] sm:$0xff]  ;;  %v547_v14 = vld [vmem:[%s452_s6] sm:$0xff]  ;;  %s1646_s6 = sshll.u32 %s682_s16, 4  ;;  %s1802_s12 = sld [smem:[#allocation34_spill]]  ;;  %s687_s6 = int_to_ptr.hbm [resolvable:$true] %s1646_s6 }
  0x76   : > { %573 = vmatpush.msra.mxu0 %v550_v6  ;;  %640 = vmatpush.msra.mxu2 %v616_v4  ;;  %v548_v12 = vld [vmem:[#allocation8] sm:$0xff]  ;;  %v1038_v15 = vld [vmem:[%s1752_s7] ss:$0 sm:$0xff]  ;;  %s1804_s29 = sld [smem:[#allocation33_spill]]  ;;  %s546_s13 = scalar_lea.vmem [#allocation16], %s1597_s14 }
  0x77   : > { %607 = vmatpush.msra.mxu1 %v583_v7  ;;  %v581_v13 = vld [vmem:[%s462_s15] sm:$0xff]  ;;  %s1651_s15 = sshll.u32 %s532_s22, 4  ;;  %s1668_s8 = sshll.u32 %s546_s13, 4  ;;  %s699_s8 = int_to_ptr.vmem [resolvable:$true] %s1668_s8 }
  0x78   : > { %574 = vmatpush.msra.mxu0 %v549_v8  ;;  %641 = vmatpush.msra.mxu2 %v615_v9  ;;  %1801 = sst [smem:[#allocation29_spill]] %s1651_s15  ;;  %s1235_s20 = sshra.s32 %s687_s6, 4  ;;  %s1236_s20 = int_to_ptr.hbm [resolvable:$true] %s1235_s20 }
  0x79   : > { %930 = vmatmul.msk.f32.vlgmr.msra.gmra.mxu2 %vm556_vm0, %v614_v10  ;;  %608 = vmatpush.msra.mxu1 %v582_v11  ;;  %v1039_v16 = vld [vmem:[%s1800_s11] ss:$0 sm:$0xff]  ;;  %s1237_s30 = scalar_lea.hbm %s1236_s20, 8  ;;  %p1242_p7 = scmp.lt.s32.totalorder %s1236_s20, %s1755_s10 }
  0x7a   : > { %575 = vmatpush.msra.mxu0 %v548_v12  ;;  %929 = vmatmul.msk.f32.vlgmr.msra.gmra.mxu1 %vm556_vm0, %v581_v13  ;;  %p1238_p13 = scmp.ne.s32.totalorder %s1236_s20, %s1237_s30 }
  0x7b   : > { %928 = vmatmul.msk.f32.vlgmr.msra.gmra.mxu0 %vm556_vm0, %v547_v14  ;;  %s696_s3 = scalar_lea.hbm %s1802_s12, %s934_s21  ;;  %s1674_s21 = scalar_lea.sflag [#allocation15], %s458_s25 }
  0x7c   : > { %v1040_v21 = vld [vmem:[%s1804_s29] ss:$0 sm:$0xff]  ;;  %s1670_s11 = sshll.u32 %s696_s3, 4  ;;  %p1239_p4 = pnand %p1238_p13, %p1495_p0  ;;  %s701_s11 = int_to_ptr.hbm [resolvable:$true] %s1670_s11 }
  0x7e   : > { %p1240_p1 = pneg %p1239_p4 }
  0xf7   : > { %v610_v17 = vpop.f32.mrf.mxu1 }
  0xf8   : > { %v611_v18 = vadd.f32 %v1038_v15, %v610_v17  ;;  %v577_v19 = vpop.f32.mrf.mxu0 }
  0xf9   : > { %v578_v20 = vadd.f32 %v1039_v16, %v577_v19 }
  0xfa   : > { %613 = vst.msk [vmem:[%s539_s23] sm:$0xff] %vm556_vm0, %v611_v18  ;;  %s1241_s23 = scalar_lea.hbm %s1755_s10, 16 }
  0xfb   : > { %p1243_p10 = scmp.lt.s32.totalorder %s1241_s23, %s1237_s30 }
  0xfd   : > { %p1244_p6 = por %p1243_p10, %p1242_p7 }
  0xff   : > { %p1245_p11 = pnand %p1244_p6, %p1240_p1 }
 0x101   : > { %1248 = shalt.err (!%p1245_p11)
}
 0x102   : > { %958 = dma.vmem_to_hbm [thread:$0]  (%p1495_p0), %s685_s28, 128, %s687_s6, %s1674_s21   ;;  %580 = vst.msk [vmem:[%s532_s22] sm:$0xff] %vm556_vm0, %v578_v20  ;;  %v643_v22 = vpop.f32.mrf.mxu2 }
 0x103   : > { %s648_s24 = scalar_lea.sflag [#allocation4], %s1594_s27  ;;  %s1263_s25 = sshra.s32 %s673_s1, 4  ;;  %s1264_s25 = int_to_ptr.hbm [resolvable:$true] %s1263_s25 }
 0x104   : > { %s1265_s15 = scalar_lea.hbm %s1264_s25, 8  ;;  %s1269_s30 = scalar_lea.hbm %s1754_s9, 16 }
 0x105   : > { %p1266_p12 = scmp.ne.s32.totalorder %s1264_s25, %s1265_s15  ;;  %p1270_p9 = scmp.lt.s32.totalorder %s1264_s25, %s1754_s9 }
 0x106   : > { %p1271_p2 = scmp.lt.s32.totalorder %s1269_s30, %s1265_s15 }
 0x107   : > { %p1267_p3 = pnand %p1266_p12, %p1495_p0 }
 0x108   : > { %p1272_p13 = por %p1271_p2, %p1270_p9 }
 0x109   : > { %p1268_p8 = pneg %p1267_p3 }
 0x10b   : > { %p1273_p4 = pnand %p1272_p13, %p1268_p8 }
 0x10d   : > { %1276 = shalt.err (!%p1273_p4)
}
 0x10e   : > { %s1805_s27 = sld [smem:[#allocation29_spill]]  ;;  %v644_v23 = vadd.f32 %v1040_v21, %v643_v22  ;;  %s1291_s6 = sshra.s32 %s701_s11, 4  ;;  %s1292_s6 = int_to_ptr.hbm [resolvable:$true] %s1291_s6 }
 0x10f   : > { %s1293_s22 = scalar_lea.hbm %s1292_s6, 8  ;;  %s1297_s25 = scalar_lea.hbm %s1802_s12, 16 }
 0x110   : > { %646 = vst.msk [vmem:[%s546_s13] sm:$0xff] %vm556_vm0, %v644_v23  ;;  %p1294_p1 = scmp.ne.s32.totalorder %s1292_s6, %s1293_s22  ;;  %p1298_p6 = scmp.lt.s32.totalorder %s1292_s6, %s1802_s12 }
 0x111   : > { %p1299_p11 = scmp.lt.s32.totalorder %s1297_s25, %s1293_s22 }
 0x112   : > { %p1295_p7 = pnand %p1294_p1, %p1495_p0 }
 0x113   : > { %p1300_p12 = por %p1299_p11, %p1298_p6 }
 0x114   : > { %s1806_s28 = int_to_ptr.vmem [resolvable:$true] %s1805_s27  ;;  %p1296_p10 = pneg %p1295_p7 }
 0x115   : > { %957 = dma.vmem_to_hbm [thread:$0]  (%p1495_p0), %s1806_s28, 128, %s673_s1, %s648_s24  }
 0x116   : > { %p1301_p3 = pnand %p1300_p12, %p1296_p10 }
 0x118   : > { %1304 = shalt.err (!%p1301_p3)
}
 0x119   : > { %959 = dma.vmem_to_hbm [thread:$0]  (%p1495_p0), %s699_s8, 128, %s701_s11, %s1674_s21  }
 0x11a PF: > { %s1807_s14 = sld [smem:[#allocation23_spill]] }
 0x11b   : > { %s1809_s13 = sld [smem:[#allocation24_spill]] }
 0x120   : > { %s712_s24 = sand.u32 1, %s1807_s14  }
 0x121   : > { %p1810_p8 = scmp.ge.s32.totalorder %s1809_s13, 2  ;;  %s713_s20 = scalar_lea.sflag [#allocation4], %s712_s24 }
 0x123   : > { %p984_p9 = pnand %p1810_p8, %p1503_p5 }
 0x125   : > { %p985_p2 = pneg %p984_p9 }
 0x127   : > { %1338 = dma.done.wait (%p985_p2), %s713_s20, 128  }
 0x128   : > { %1340 = vsyncadd (%p985_p2), %s713_s20, 4294967168  ;;  %s1811_s30 = sadd.s32 4294967294, %s1809_s13  }
 0x129   : > { %s722_s16 = sand.u32 1, %s1811_s30  }
 0x12a   : > { %s723_s17 = scalar_lea.sflag [#allocation15], %s722_s16 }
 0x12b   : > { %1342 = dma.done.wait (%p985_p2), %s723_s17, 256  }
 0x12c   : > { %1344 = vsyncadd (%p985_p2), %s723_s17, 4294967040  ;;  %s1812_s20 = sld [smem:[#allocation25_spill]]  ;;  %s1814_s17 = smov %s1351_s18 }
 0x12d   : > { %s1813_s26 = sld [smem:[#allocation26_spill]]  ;;  %s1815_s18 = smov %s1355_s19 }
 0x132   : > { %p33_p0 = scmp.ge.s32.totalorder %s1812_s20, 4  }
 0x133   : > { %s1816_s19 = smov %s1813_s26 }
 0x134   :  { %35 = sbr.rel (!%p33_p0) target bundleno = 17 (0x11), region = 169 }
 0x139   :  { %739 = vsyncpa [#allocation3], 1 }
 0x13a   :  { %741 = vsyncpa [#allocation3 + $0x1], 1 }
 0x13b   :  { %742 = vsyncpa [#allocation6], 1 }
 0x13c   :  { %744 = vsyncpa [#allocation6 + $0x1], 1 }
 0x13d   :  { %745 = vsyncpa [#allocation9], 1 }
 0x13e   :  { %746 = vsyncpa [#allocation12], 1 }
 0x13f   :  { %747 = vsyncpa [#allocation4], 1 }
 0x140   :  { %749 = vsyncpa [#allocation4 + $0x1], 1 }
 0x141   :  { %750 = vsyncpa [#allocation15], 1 }
 0x142   :  { %752 = vsyncpa [#allocation15 + $0x1], 1 }

</bundles_post_ra>
